<compile_context>
chip_gen: v7x
topology: tpu7x:2x2x1
jax: 0.10.0
libtpu: 0.0.40
codegen_flags: <defaults>
</compile_context>

<pallas_src>
import numpy as np
import jax
import jax.numpy as jnp
from jax.experimental import pallas as pl
from jax.experimental.pallas import tpu as pltpu


def _pca_reduce_kernel(x_ref, ld_ref, bias_ref, o_ref):
    # x_ref   : (TB, C, TP)  spatial tile of TB batch elements
    # ld_ref  : (R, C)       PCA loadings (resident across all grid steps)
    # bias_ref: (R, 1)       f32 bias = loadings @ means (resident)
    # o_ref   : (TB, R, TP)
    ld = ld_ref[...]
    bias = bias_ref[...]
    for b in range(x_ref.shape[0]):            # TB is small -> static unroll
        proj = jnp.dot(ld, x_ref[b], preferred_element_type=jnp.float32)
        o_ref[b] = (proj - bias).astype(o_ref.dtype)


def _tpu_budgets():
    """(per-stream tile byte target, scoped vmem_limit_bytes), per generation."""
    vmem_cap = None
    try:
        vmem_cap = int(getattr(pltpu.get_tpu_info(), "vmem_capacity_bytes", 0)) or None
    except Exception:  # detection failure -> conservative defaults
        vmem_cap = None
    if vmem_cap is not None and vmem_cap <= 64 * 1024 * 1024:
        # v7x-like: 64 MiB VMEM per TensorCore — keep tiles / scoped VMEM modest.
        return 3 * 1024 * 1024 + 512 * 1024, 48 * 1024 * 1024
    if vmem_cap is None:
        # Unknown chip: settings that are safe everywhere.
        return 4 * 1024 * 1024, 48 * 1024 * 1024
    # v5e / v6e: 128 MiB VMEM — larger tiles amortize the per-step overhead.
    return 7 * 1024 * 1024, 64 * 1024 * 1024


def _choose_tiles(B, C, R, P, itemsize, target_bytes):
    """Lane-dense spatial tile + batch tile sized to the per-stream byte target."""
    row_bytes = max(C, R) * itemsize
    if P <= 128:
        TP = P                                   # full-extent block (allowed)
    else:
        cap = max(128, (target_bytes // row_bytes) // 128 * 128)
        TP = min((P // 128) * 128, cap)          # ragged tail handled by Pallas
    NP = pl.cdiv(P, TP)

    tile_bytes = max(C, R) * TP * itemsize
    TB = max(1, min(B, int(target_bytes // max(tile_bytes, 1))))
    TB = min(TB, 8)                              # keep the static unroll short
    NB = pl.cdiv(B, TB)
    return TP, NP, TB, NB


def pca_reduce(x: jax.Array, loadings: jax.Array, means: jax.Array) -> jax.Array:
    """x: (B, C, H, W), loadings: (R, C), means: (C,)  ->  (B, R, H, W)."""
    B, C, H, W = x.shape
    R, C2 = loadings.shape
    assert C2 == C and means.shape == (C,)

    P = H * W
    x_flat = x.reshape(B, C, P)                  # row-major, zero-cost

    # Fold the mean subtraction into an f32 bias: loadings @ means.  The mean
    # term stays in f32 even for bf16 inputs (matches the f32 PyTorch buffers).
    bias = jnp.matmul(loadings.astype(jnp.float32),
                      means.astype(jnp.float32)).reshape(R, 1)
    ld = loadings.astype(x.dtype)                # MXU consumes x's dtype

    target_bytes, vmem_limit = _tpu_budgets()
    TP, NP, TB, NB = _choose_tiles(B, C, R, P, x.dtype.itemsize, target_bytes)

    cost = pl.CostEstimate(
        flops=2 * B * R * C * P,
        transcendentals=0,
        bytes_accessed=(B * C * P + B * R * P) * x.dtype.itemsize
        + R * C * x.dtype.itemsize + R * 4,
    )

    # TODO(synk): tile the channel (contraction) axis too if C ever grows so
    # large that a (C, TP) tile no longer fits the per-stream VMEM budget.
    out_flat = pl.pallas_call(
        _pca_reduce_kernel,
        out_shape=jax.ShapeDtypeStruct((B, R, P), x.dtype),
        grid_spec=pltpu.PrefetchScalarGridSpec(
            num_scalar_prefetch=0,
            # Large spatial axis first so a v7x 2-TensorCore split is balanced
            # even when B is 1 / odd.
            grid=(NP, NB),
            in_specs=[
                pl.BlockSpec((TB, C, TP), lambda p, b: (b, 0, p)),
                pl.BlockSpec((R, C), lambda p, b: (0, 0)),    # resident weights
                pl.BlockSpec((R, 1), lambda p, b: (0, 0)),    # resident f32 bias
            ],
            out_specs=pl.BlockSpec((TB, R, TP), lambda p, b: (b, 0, p)),
        ),
        compiler_params=pltpu.CompilerParams(
            # Disjoint output blocks on both axes -> fully parallel; lets v7x
            # shard the grid across its 2 TensorCores (no-op on v5e/v6e).
            dimension_semantics=("parallel", "parallel"),
            vmem_limit_bytes=vmem_limit,
        ),
        cost_estimate=cost,
    )(x_flat, ld, bias)

    return out_flat.reshape(B, R, H, W)          # zero-cost, channel-first


if __name__ == "__main__":
    # Small shapes consistent with the module: batch=2, channels=32,
    # spatial 16x16 (H*W = 256 = 2*128, lane-dense), reduce_dim=8.
    B, C, H, W, R = 2, 32, 16, 16, 8

    key = jax.random.PRNGKey(0)
    kx, kl, km = jax.random.split(key, 3)
    x = jax.random.normal(kx, (B, C, H, W), dtype=jnp.float32)
    loadings = (jax.random.normal(kl, (R, C), dtype=jnp.float32)
                / np.float32(np.sqrt(C)))
    means = 0.1 * jax.random.normal(km, (C,), dtype=jnp.float32)

    out = pca_reduce(x, loadings, means)
    out = jax.block_until_ready(out)

    # Pure-JAX reference mirroring the PyTorch module exactly.
    projected = x - means.reshape(1, C, 1, 1)
    projected = jnp.transpose(projected, (0, 2, 3, 1)).reshape(B, H * W, C)
    projected = jnp.matmul(projected, loadings.T,
                           precision=jax.lax.Precision.HIGHEST)
    ref = jnp.transpose(projected.reshape(B, H, W, R), (0, 3, 1, 2))

    # Tolerance allows for MXU f32 pass rounding / accumulation-order effects.
    np.testing.assert_allclose(np.asarray(out), np.asarray(ref),
                               rtol=5e-3, atol=5e-3)

    print("KERNEL_OK")
</pallas_src>

<mosaic_0001>
module attributes {stable_mosaic.version = 11 : i64} {
  func.func @_pca_reduce_kernel(%arg0: i32, %arg1: i32, %arg2: memref<2x32x256xf32, #tpu.memory_space<vmem>>, %arg3: memref<8x32xf32, #tpu.memory_space<vmem>>, %arg4: memref<8x1xf32, #tpu.memory_space<vmem>>, %arg5: memref<2x8x256xf32, #tpu.memory_space<vmem>>) attributes {dimension_semantics = [#tpu.dimension_semantics<parallel>, #tpu.dimension_semantics<parallel>], iteration_bounds = array<i64: 1, 1>, scalar_prefetch = 0 : i64, scratch_operands = 0 : i64, tpu.core_type = #tpu.core_type<tc>, window_params = [{transform_indices = @transform_0, window_bounds = array<i64: 2, 32, 256>}, {pipeline_mode = #tpu.pipeline_mode<synchronous>, transform_indices = @transform_1, window_bounds = array<i64: 8, 32>}, {pipeline_mode = #tpu.pipeline_mode<synchronous>, transform_indices = @transform_2, window_bounds = array<i64: 8, 1>}, {transform_indices = @transform_3, window_bounds = array<i64: 2, 8, 256>}]} {
    %c0 = arith.constant 0 : index
    %c0_0 = arith.constant 0 : index
    %0 = vector.load %arg3[%c0, %c0_0] : memref<8x32xf32, #tpu.memory_space<vmem>>, vector<8x32xf32>
    %c0_1 = arith.constant 0 : index
    %c0_2 = arith.constant 0 : index
    %1 = vector.load %arg4[%c0_1, %c0_2] : memref<8x1xf32, #tpu.memory_space<vmem>>, vector<8x1xf32>
    %c0_3 = arith.constant 0 : index
    %c0_4 = arith.constant 0 : index
    %c0_5 = arith.constant 0 : index
    %2 = vector.load %arg2[%c0_3, %c0_4, %c0_5] : memref<2x32x256xf32, #tpu.memory_space<vmem>>, vector<1x32x256xf32>
    %3 = vector.shape_cast %2 : vector<1x32x256xf32> to vector<32x256xf32>
    %cst = arith.constant dense<0.000000e+00> : vector<8x256xf32>
    %4 = tpu.matmul %0, %3, %cst {dimension_numbers = #tpu.dot_dimension_numbers<[1], [0], [0], [1], [0, 0, 1, 1], [], []>} : vector<8x32xf32>, vector<32x256xf32>, vector<8x256xf32> -> vector<8x256xf32>
    %5 = vector.broadcast %1 : vector<8x1xf32> to vector<8x256xf32>
    %6 = arith.subf %4, %5 : vector<8x256xf32>
    %c0_6 = arith.constant 0 : index
    %c0_7 = arith.constant 0 : index
    %c0_8 = arith.constant 0 : index
    %7 = vector.load %arg5[%c0_6, %c0_7, %c0_8] : memref<2x8x256xf32, #tpu.memory_space<vmem>>, vector<1x8x256xf32>
    %8 = vector.shape_cast %7 : vector<1x8x256xf32> to vector<8x256xf32>
    %9 = vector.shape_cast %6 : vector<8x256xf32> to vector<1x8x256xf32>
    tpu.vector_store %arg5[%c0_6, %c0_7, %c0_8], %9 {strides = array<i32>} : memref<2x8x256xf32, #tpu.memory_space<vmem>>, vector<1x8x256xf32>,
    %c1 = arith.constant 1 : index
    %c0_9 = arith.constant 0 : index
    %c0_10 = arith.constant 0 : index
    %10 = vector.load %arg2[%c1, %c0_9, %c0_10] : memref<2x32x256xf32, #tpu.memory_space<vmem>>, vector<1x32x256xf32>
    %11 = vector.shape_cast %10 : vector<1x32x256xf32> to vector<32x256xf32>
    %cst_11 = arith.constant dense<0.000000e+00> : vector<8x256xf32>
    %12 = tpu.matmul %0, %11, %cst_11 {dimension_numbers = #tpu.dot_dimension_numbers<[1], [0], [0], [1], [0, 0, 1, 1], [], []>} : vector<8x32xf32>, vector<32x256xf32>, vector<8x256xf32> -> vector<8x256xf32>
    %13 = vector.broadcast %1 : vector<8x1xf32> to vector<8x256xf32>
    %14 = arith.subf %12, %13 : vector<8x256xf32>
    %c1_12 = arith.constant 1 : index
    %c0_13 = arith.constant 0 : index
    %c0_14 = arith.constant 0 : index
    %15 = vector.load %arg5[%c1_12, %c0_13, %c0_14] : memref<2x8x256xf32, #tpu.memory_space<vmem>>, vector<1x8x256xf32>
    %16 = vector.shape_cast %15 : vector<1x8x256xf32> to vector<8x256xf32>
    %17 = vector.shape_cast %14 : vector<8x256xf32> to vector<1x8x256xf32>
    tpu.vector_store %arg5[%c1_12, %c0_13, %c0_14], %17 {strides = array<i32>} : memref<2x8x256xf32, #tpu.memory_space<vmem>>, vector<1x8x256xf32>,
    return
  }
  func.func @transform_0(%arg0: i32, %arg1: i32) -> (i32, i32, i32) {
    %c0_i32 = arith.constant 0 : i32
    %c0_i32_0 = arith.constant 0 : i32
    return %arg1, %c0_i32, %arg0 : i32, i32, i32
  }
  func.func @transform_1(%arg0: i32, %arg1: i32) -> (i32, i32) {
    %c0_i32 = arith.constant 0 : i32
    %c0_i32_0 = arith.constant 0 : i32
    %c0_i32_1 = arith.constant 0 : i32
    return %c0_i32, %c0_i32_0 : i32, i32
  }
  func.func @transform_2(%arg0: i32, %arg1: i32) -> (i32, i32) {
    %c0_i32 = arith.constant 0 : i32
    %c0_i32_0 = arith.constant 0 : i32
    %c0_i32_1 = arith.constant 0 : i32
    return %c0_i32, %c0_i32_0 : i32, i32
  }
  func.func @transform_3(%arg0: i32, %arg1: i32) -> (i32, i32, i32) {
    %c0_i32 = arith.constant 0 : i32
    %c0_i32_0 = arith.constant 0 : i32
    return %arg1, %c0_i32, %arg0 : i32, i32, i32
  }
}

</mosaic_0001>

<bundles_post_ra>
// kernel: tpu_custom_call.1
= control target key start
LH: loop header
LB: loop body
LE: loop exit
PB: predicated region body
PF: predicated region fallthrough
CT: control target
= control target key end

     0   :  { %8 = vsyncpa [#allocation3], 0  ;;  %s360_s0 = inlined_call_operand.hbm [shape: f32[2,32,256], index: 0, kind: input, shape index: {}]   ;;  %s361_s1 = inlined_call_operand.vmem [shape: f32[8,32], index: 1, kind: input, shape index: {}]   ;;  %s362_s2 = inlined_call_operand.vmem [shape: f32[8,1], index: 2, kind: input, shape index: {}]   ;;  %s363_s3 = inlined_call_operand.hbm [shape: f32[2,8,256], index: 3, kind: output, shape index: {}]  }
   0x1   :  { %9 = vsyncpa [#allocation4], 0  ;;  %s298_s12 = smov [#allocation2]   ;;  %s250_s16 = scalar_lea.hbm %s360_s0, 2048 }
   0x2   :  { %s15_s13 = sshll.u32 %s298_s12, 4  ;;  %p251_p0 = scmp.ne.s32.totalorder %s360_s0, %s250_s16  ;;  %s16_s13 = int_to_ptr.vmem [resolvable:$true] %s15_s13 }
   0x3   :  { %p254_p1 = scmp.lt.u32.totalorder %s250_s16, %s360_s0 }
   0x5   :  { %p256_p2 = pnand %p254_p1, %p251_p0 }
   0x7   :  { %259 = shalt.err (!%p256_p2)
}
   0x8   :  { %s260_s21 = scalar_lea.vmem %s16_s13, 2048  ;;  %p265_p4 = scmp.lt.s32.totalorder %s16_s13, %s16_s13 }
   0x9   :  { %p261_p3 = scmp.ne.s32.totalorder %s16_s13, %s260_s21  ;;  %p266_p5 = scmp.lt.s32.totalorder %s260_s21, %s260_s21 }
   0xb   :  { %p267_p6 = por %p266_p5, %p265_p4 }
   0xd   :  { %p268_p7 = pnand %p267_p6, %p261_p3 }
   0xf   :  { %271 = shalt.err (!%p268_p7)
}
  0x10   :  { %s299_s22 = smov 256   ;;  %s300_s23 = smov 16  }
  0x11   :  { %21 = dma.hbm_to_vmem [thread:$0]  %s360_s0, 2048, %s16_s13, [#allocation3], %s299_s22, %s299_s22, %s300_s23  }
  0x12   :  { %294 = dma.done.wait [#allocation3], 2048  }
  0x13   :  { %295 = vsyncadd [#allocation3], 4294965248  ;;  %v301_v0 = vmov 0.0   ;;  %v302_v1 = vmov 0   ;;  %v32_v2 = vld [vmem:[#allocation2 + $0x8] sm:$0xff]  ;;  %v34_v3 = vld [vmem:[#allocation2 + $0x18] sm:$0xff] }
  0x14   :  { %107 = vmatprep.mubr.f32.mxu0 %v301_v0  ;;  %196 = vmatprep.mubr.f32.mxu1 %v301_v0  ;;  %v125_v4 = vld [vmem:[#allocation2 + $0x48] sm:$0xff]  ;;  %v227_v5 = vpack.c.bf16 %v34_v3, %v32_v2  ;;  %v127_v6 = vld [vmem:[#allocation2 + $0x58] sm:$0xff]  ;;  %v31_v7 = vld [vmem:[#allocation2] sm:$0xff]  ;;  %vm39_vm0 = vcmask 261120   ;;  %s303_s29 = smov [#allocation5]  }
  0x15   :  { %249 = vset.pattern.permute.xlu0 %v302_v1  ;;  %v33_v8 = vld [vmem:[#allocation2 + $0x10] sm:$0xff]  ;;  %v235_v9 = vpack.c.bf16 %v127_v6, %v125_v4  ;;  %v124_v11 = vld [vmem:[#allocation2 + $0x40] sm:$0xff]  ;;  %v36_v13 = vld [vmem:[#allocation2 + $0x28] sm:$0xff]  ;;  %s213_s30 = sshll.u32 %s303_s29, 4  ;;  %s214_s30 = int_to_ptr.vmem [resolvable:$true] %s213_s30 }
  0x16   :  { %v229_v10 = vpack.c.bf16 %v33_v8, %v31_v7  ;;  %v126_v12 = vld [vmem:[#allocation2 + $0x50] sm:$0xff]  ;;  %228 = vmatprep.subr.bf16.mxu0 %v227_v5  ;;  %v38_v15 = vld [vmem:[#allocation2 + $0x38] sm:$0xff]  ;;  %v129_v16 = vld [vmem:[#allocation2 + $0x68] sm:$0xff]  ;;  %p277_p9 = scmp.lt.s32.totalorder %s214_s30, %s214_s30 }
  0x17   :  { %v237_v14 = vpack.c.bf16 %v126_v12, %v124_v11  ;;  %v131_v17 = vld [vmem:[#allocation2 + $0x78] sm:$0xff]  ;;  %236 = vmatprep.subr.bf16.mxu1 %v235_v9  ;;  %v231_v18 = vpack.c.bf16 %v38_v15, %v36_v13  ;;  %v35_v20 = vld [vmem:[#allocation2 + $0x20] sm:$0xff]  ;;  %v37_v21 = vld [vmem:[#allocation2 + $0x30] sm:$0xff] }
  0x18   :  { %230 = vmatpush1.bf16.msra.mxu0 %v229_v10  ;;  %v239_v19 = vpack.c.bf16 %v131_v17, %v129_v16  ;;  %v128_v22 = vld [vmem:[#allocation2 + $0x60] sm:$0xff]  ;;  %v233_v23 = vpack.c.bf16 %v37_v21, %v35_v20  ;;  %v130_v24 = vld [vmem:[#allocation2 + $0x70] sm:$0xff] }
  0x19   :  { %238 = vmatpush1.bf16.msra.mxu1 %v237_v14  ;;  %v30_v25 = vld [vmem:[%s362_s2] sm:$0xff]  ;;  %232 = vmatprep.subr.bf16.mxu0 %v231_v18  ;;  %v241_v26 = vpack.c.bf16 %v130_v24, %v128_v22 }
  0x1a   :  { %240 = vmatprep.subr.bf16.mxu1 %v239_v19  ;;  %116 = vperm.xlu0 %249, %v30_v25   ;;  %v29_v27 = vld [vmem:[%s361_s1] sm:$0xff]  ;;  %s272_s1 = scalar_lea.vmem %s214_s30, 512 }
  0x1b   :  { %p273_p8 = scmp.ne.s32.totalorder %s214_s30, %s272_s1  ;;  %p278_p10 = scmp.lt.s32.totalorder %s272_s1, %s272_s1 }
  0x1c   :  { %234 = vmatpush1.bf16.msra.mxu0 %v233_v23 }
  0x1d   :  { %242 = vmatpush1.bf16.msra.mxu1 %v241_v26  ;;  %p279_p11 = por %p278_p10, %p277_p9 }
  0x1f   :  { %225 = vmatmul.mubr.msk.f32.vlgmr.msra.gmra.mrb[0].mxu0 %vm39_vm0, %v29_v27  ;;  %p280_p12 = pnand %p279_p11, %p273_p8 }
  0x20   :  { %226 = vmatmul.mubr.msk.f32.vlgmr.msra.gmra.mrb[0].mxu1 %vm39_vm0, %v29_v27 }
  0x99   :  { %v117_v28 = vpop.permute.xlu0 %116 }
  0xf2   :  { %v109_v29 = vpop.f32.mrb[0].mxu0 }
  0xf3   :  { %v119_v30 = vsub.f32 %v109_v29, %v117_v28  ;;  %v198_v31 = vpop.f32.mrb[0].mxu1  ;;  %v111_v32 = vpop.f32.mrb[1].mxu0 }
  0xf4   :  { %v203_v33 = vsub.f32 %v198_v31, %v117_v28  ;;  %v120_v34 = vsub.f32 %v111_v32, %v117_v28  ;;  %v200_v35 = vpop.f32.mrb[1].mxu1 }
  0xf5   :  { %121 = vst [vmem:[#allocation5] sm:$0xff] %v119_v30  ;;  %v204_v36 = vsub.f32 %v200_v35, %v117_v28 }
  0xf6   :  { %206 = vst [vmem:[#allocation5 + $0x10] sm:$0xff] %v203_v33  ;;  %122 = vst [vmem:[#allocation5 + $0x8] sm:$0xff] %v120_v34 }
  0xf7   :  { %207 = vst [vmem:[#allocation5 + $0x18] sm:$0xff] %v204_v36 }
  0xf8   :  { %283 = shalt.err (!%p280_p12)
}
  0xf9   :  { %s284_s5 = scalar_lea.hbm %s363_s3, 512 }
  0xfa   :  { %p285_p13 = scmp.ne.s32.totalorder %s363_s3, %s284_s5  ;;  %p288_p0 = scmp.lt.u32.totalorder %s284_s5, %s363_s3 }
  0xfc   :  { %p290_p1 = pnand %p288_p0, %p285_p13 }
  0xfe   :  { %293 = shalt.err (!%p290_p1)
}
  0xff   :  { %219 = dma.vmem_to_hbm [thread:$0]  %s214_s30, 512, %s363_s3, [#allocation4], %s299_s22, %s299_s22, %s300_s23  }
 0x100   :  { %296 = dma.done.wait [#allocation4], 512  }
 0x101   :  { %297 = vsyncadd [#allocation4], 4294966784 }
 0x102   :  { %223 = vsyncpa [#allocation3], 1 }
 0x103   :  { %224 = vsyncpa [#allocation4], 1 }

</bundles_post_ra>
